<compile_context>
chip_gen: v7x
topology: tpu7x:2x2x1
jax: 0.10.0
libtpu: 0.0.40
codegen_flags: <defaults>
</compile_context>

<pallas_src>
import jax
import jax.numpy as jnp
from jax.experimental import pallas as pl
from jax.experimental.pallas import tpu as pltpu


def _round_up(x, m):
    return ((x + m - 1) // m) * m


def _discriminator_kernel(x_ref, w1_ref, b1_ref, w2_ref, b2_ref, out_ref):
    # x:  (TB, F) bf16   w1: (F, H) bf16   b1: (1, H) f32
    # w2: (1, H)  f32    b2: (1, 1) f32 in SMEM        out: (TB, 1) f32
    # First linear (MXU, bf16 inputs, f32 accumulation) + bias + ReLU (VPU, f32).
    h = jnp.dot(x_ref[...], w1_ref[...], preferred_element_type=jnp.float32)
    h = jnp.maximum(h + b1_ref[...], 0.0)
    # Second linear has output width 1 -> keep it off the MXU: VPU multiply + XLU
    # lane reduction, plus a scalar bias read from SMEM.
    logits = jnp.sum(h * w2_ref[...], axis=-1, keepdims=True) + b2_ref[0, 0]
    out_ref[...] = logits.astype(out_ref.dtype)


def _pick_batch_tile(B, F, H, max_tile=512, vmem_budget_bytes=24 << 20):
    """Largest batch tile (multiple of 8, <= max_tile) that keeps the pipeline
    comfortably inside the default scoped VMEM on every TPU generation."""
    # Grid-invariant operands (double-buffered by default): w1 (bf16), b1, w2 (f32).
    fixed = 2 * (2 * F * H + 4 * H + 4 * H)
    # Per batch row: x tile (bf16, 2 buffers) + f32 hidden intermediate + out (2 buffers).
    per_row = 2 * (2 * F) + 4 * H + 2 * 4
    avail_rows = max(8, (vmem_budget_bytes - fixed) // per_row)
    tb = min(max_tile, _round_up(B, 8), int(avail_rows))
    return max(8, (tb // 8) * 8)


def domain_discriminator(f, w1, b1, w2, b2, *, block_b=512):
    """f: (B, in_feature_dim). Returns (B, 1) float32 logits.

    Matches: nn.Linear(F, H) -> ReLU -> nn.Linear(H, 1), with w1 = W1.T (F, H),
    w2 = W2.T (H, 1).
    """
    B, F = f.shape
    H = w1.shape[1]
    assert w1.shape == (F, H)
    assert w2.shape == (H, 1)

    TB = _pick_batch_tile(B, F, H, max_tile=block_b)
    Bp = _round_up(B, TB)
    num_tiles = Bp // TB

    # Feed the bandwidth-dominant operands in bf16; everything else stays f32.
    x = f.astype(jnp.bfloat16)
    if Bp != B:
        x = jnp.pad(x, ((0, Bp - B), (0, 0)))
    w1_bf = w1.astype(jnp.bfloat16)
    b1_2d = b1.reshape(1, H).astype(jnp.float32)
    w2_row = w2.reshape(1, H).astype(jnp.float32)   # row layout for the VPU epilogue
    b2_2d = b2.reshape(1, 1).astype(jnp.float32)    # scalar, lives in SMEM

    cost = pl.CostEstimate(
        flops=2 * Bp * F * H + 2 * Bp * H,
        transcendentals=0,
        bytes_accessed=2 * Bp * F + 2 * F * H + 4 * (2 * H + 1) + 4 * Bp,
    )

    out = pl.pallas_call(
        _discriminator_kernel,
        out_shape=jax.ShapeDtypeStruct((Bp, 1), jnp.float32),
        grid_spec=pltpu.PrefetchScalarGridSpec(
            num_scalar_prefetch=0,
            grid=(num_tiles,),
            in_specs=[
                pl.BlockSpec((TB, F), lambda i: (i, 0)),     # x: streamed over batch
                pl.BlockSpec((F, H), lambda i: (0, 0)),      # w1: grid-invariant
                pl.BlockSpec((1, H), lambda i: (0, 0)),      # b1: grid-invariant
                pl.BlockSpec((1, H), lambda i: (0, 0)),      # w2 row: grid-invariant
                pl.BlockSpec(memory_space=pltpu.MemorySpace.SMEM),  # b2 scalar
            ],
            out_specs=pl.BlockSpec((TB, 1), lambda i: (i, 0)),
        ),
        compiler_params=pltpu.CompilerParams(
            dimension_semantics=("parallel",),  # batch tiles are independent (2 TCs on v7x)
        ),
        cost_estimate=cost,
    )(x, w1_bf, b1_2d, w2_row, b2_2d)

    return out[:B]


def init_params(key, in_feature_dim, hidden_dim):
    """Deterministic init mimicking PyTorch nn.Linear default (U[-1/sqrt(fan_in), 1/sqrt(fan_in)])."""
    k1, k2, k3, k4 = jax.random.split(key, 4)
    bound1 = 1.0 / (in_feature_dim ** 0.5)
    bound2 = 1.0 / (hidden_dim ** 0.5)
    # Stored already transposed: W1 (F, H), W2 (H, 1).
    w1 = jax.random.uniform(k1, (in_feature_dim, hidden_dim), jnp.float32, -bound1, bound1)
    b1 = jax.random.uniform(k2, (hidden_dim,), jnp.float32, -bound1, bound1)
    w2 = jax.random.uniform(k3, (hidden_dim, 1), jnp.float32, -bound2, bound2)
    b2 = jax.random.uniform(k4, (1,), jnp.float32, -bound2, bound2)
    return w1, b1, w2, b2


if __name__ == "__main__":
    key = jax.random.PRNGKey(0)
    k_x, k_p = jax.random.split(key)

    # Small shapes consistent with the module: batch=8, in_feature_dim=256, hidden_dim=128.
    B, F, H = 8, 256, 128
    x = jax.random.normal(k_x, (B, F), jnp.float32)
    w1, b1, w2, b2 = init_params(k_p, F, H)

    out = domain_discriminator(x, w1, b1, w2, b2)
    out = jax.block_until_ready(out)
    assert out.shape == (B, 1)

    # Reference in plain JAX with the same bf16 feeding of x/W1 (f32 accumulation),
    # matching the module math f @ W1 + b1 -> ReLU -> @ W2 + b2.
    x_bf = x.astype(jnp.bfloat16).astype(jnp.float32)
    w1_bf = w1.astype(jnp.bfloat16).astype(jnp.float32)
    ref = jnp.maximum(x_bf @ w1_bf + b1, 0.0) @ w2 + b2
    assert jnp.allclose(out, ref, atol=1e-3, rtol=1e-3)

    # Sanity vs. the full-precision reference (bf16 input quantization only).
    ref_f32 = jnp.maximum(x @ w1 + b1, 0.0) @ w2 + b2
    assert jnp.allclose(out, ref_f32, atol=5e-2, rtol=5e-2)

    print("KERNEL_OK")
</pallas_src>

<mosaic_0001>
module attributes {stable_mosaic.version = 11 : i64} {
  func.func @_discriminator_kernel(%arg0: i32, %arg1: memref<8x256xbf16, #tpu.memory_space<vmem>>, %arg2: memref<256x128xbf16, #tpu.memory_space<vmem>>, %arg3: memref<1x128xf32, #tpu.memory_space<vmem>>, %arg4: memref<1x128xf32, #tpu.memory_space<vmem>>, %arg5: memref<1x1xf32, #tpu.memory_space<smem>>, %arg6: memref<8x1xf32, #tpu.memory_space<vmem>>) attributes {dimension_semantics = [#tpu.dimension_semantics<parallel>], iteration_bounds = array<i64: 1>, scalar_prefetch = 0 : i64, scratch_operands = 0 : i64, tpu.core_type = #tpu.core_type<tc>, window_params = [{transform_indices = @transform_0, window_bounds = array<i64: 8, 256>}, {pipeline_mode = #tpu.pipeline_mode<synchronous>, transform_indices = @transform_1, window_bounds = array<i64: 256, 128>}, {pipeline_mode = #tpu.pipeline_mode<synchronous>, transform_indices = @transform_2, window_bounds = array<i64: 1, 128>}, {pipeline_mode = #tpu.pipeline_mode<synchronous>, transform_indices = @transform_3, window_bounds = array<i64: 1, 128>}, {transform_indices = @transform_4, window_bounds = array<i64: 1, 1>}, {transform_indices = @transform_5, window_bounds = array<i64: 8, 1>}]} {
    %c0 = arith.constant 0 : index
    %c0_0 = arith.constant 0 : index
    %0 = vector.load %arg1[%c0, %c0_0] : memref<8x256xbf16, #tpu.memory_space<vmem>>, vector<8x256xbf16>
    %c0_1 = arith.constant 0 : index
    %c0_2 = arith.constant 0 : index
    %1 = vector.load %arg2[%c0_1, %c0_2] : memref<256x128xbf16, #tpu.memory_space<vmem>>, vector<256x128xbf16>
    %cst = arith.constant dense<0.000000e+00> : vector<8x128xf32>
    %2 = tpu.matmul %0, %1, %cst {dimension_numbers = #tpu.dot_dimension_numbers<[1], [0], [0], [1], [0, 0, 1, 1], [], []>} : vector<8x256xbf16>, vector<256x128xbf16>, vector<8x128xf32> -> vector<8x128xf32>
    %c0_3 = arith.constant 0 : index
    %c0_4 = arith.constant 0 : index
    %3 = vector.load %arg3[%c0_3, %c0_4] : memref<1x128xf32, #tpu.memory_space<vmem>>, vector<1x128xf32>
    %4 = vector.broadcast %3 : vector<1x128xf32> to vector<8x128xf32>
    %5 = arith.addf %2, %4 : vector<8x128xf32>
    %cst_5 = arith.constant 0.000000e+00 : f32
    %6 = vector.broadcast %cst_5 : f32 to vector<8x128xf32>
    %7 = arith.maximumf %5, %6 : vector<8x128xf32>
    %c0_6 = arith.constant 0 : index
    %c0_7 = arith.constant 0 : index
    %8 = vector.load %arg4[%c0_6, %c0_7] : memref<1x128xf32, #tpu.memory_space<vmem>>, vector<1x128xf32>
    %9 = vector.broadcast %8 : vector<1x128xf32> to vector<8x128xf32>
    %10 = arith.mulf %7, %9 : vector<8x128xf32>
    %cst_8 = arith.constant dense<0.000000e+00> : vector<8xf32>
    %11 = vector.multi_reduction <add>, %10, %cst_8 [1] : vector<8x128xf32> to vector<8xf32>
    %12 = vector.shape_cast %11 : vector<8xf32> to vector<8x1xf32>
    %c0_9 = arith.constant 0 : index
    %c0_10 = arith.constant 0 : index
    %13 = memref.load %arg5[%c0_9, %c0_10] : memref<1x1xf32, #tpu.memory_space<smem>>
    %14 = vector.broadcast %13 : f32 to vector<8x1xf32>
    %15 = arith.addf %12, %14 : vector<8x1xf32>
    %c0_11 = arith.constant 0 : index
    %c0_12 = arith.constant 0 : index
    %16 = vector.load %arg6[%c0_11, %c0_12] : memref<8x1xf32, #tpu.memory_space<vmem>>, vector<8x1xf32>
    tpu.vector_store %arg6[%c0_11, %c0_12], %15 {strides = array<i32>} : memref<8x1xf32, #tpu.memory_space<vmem>>, vector<8x1xf32>,
    return
  }
  func.func @transform_0(%arg0: i32) -> (i32, i32) {
    %c0_i32 = arith.constant 0 : i32
    %c0_i32_0 = arith.constant 0 : i32
    return %arg0, %c0_i32 : i32, i32
  }
  func.func @transform_1(%arg0: i32) -> (i32, i32) {
    %c0_i32 = arith.constant 0 : i32
    %c0_i32_0 = arith.constant 0 : i32
    %c0_i32_1 = arith.constant 0 : i32
    return %c0_i32, %c0_i32_0 : i32, i32
  }
  func.func @transform_2(%arg0: i32) -> (i32, i32) {
    %c0_i32 = arith.constant 0 : i32
    %c0_i32_0 = arith.constant 0 : i32
    %c0_i32_1 = arith.constant 0 : i32
    return %c0_i32, %c0_i32_0 : i32, i32
  }
  func.func @transform_3(%arg0: i32) -> (i32, i32) {
    %c0_i32 = arith.constant 0 : i32
    %c0_i32_0 = arith.constant 0 : i32
    %c0_i32_1 = arith.constant 0 : i32
    return %c0_i32, %c0_i32_0 : i32, i32
  }
  func.func @transform_4(%arg0: i32) -> (i32, i32) {
    %c0_i32 = arith.constant 0 : i32
    %c0_i32_0 = arith.constant 0 : i32
    %c0_i32_1 = arith.constant 0 : i32
    return %c0_i32, %c0_i32_0 : i32, i32
  }
  func.func @transform_5(%arg0: i32) -> (i32, i32) {
    %c0_i32 = arith.constant 0 : i32
    %c0_i32_0 = arith.constant 0 : i32
    return %arg0, %c0_i32 : i32, i32
  }
}

</mosaic_0001>

<bundles_post_ra>
// kernel: tpu_custom_call.1
= control target key start
LH: loop header
LB: loop body
LE: loop exit
PB: predicated region body
PF: predicated region fallthrough
CT: control target
= control target key end

     0   :  { %11 = vsyncpa [#allocation4], 0  ;;  %s442_s0 = inlined_call_operand.hbm [shape: bf16[8,256], index: 0, kind: input, shape index: {}]   ;;  %s443_s1 = inlined_call_operand.hbm [shape: bf16[256,128], index: 1, kind: input, shape index: {}]   ;;  %s444_s2 = inlined_call_operand.vmem [shape: f32[1,128], index: 2, kind: input, shape index: {}]   ;;  %s445_s3 = inlined_call_operand.vmem [shape: f32[1,128], index: 3, kind: input, shape index: {}]   ;;  %s446_s4 = inlined_call_operand.<no memory space> [shape: f32[1,1], index: 4, kind: input, shape index: {}]   ;;  %s447_s5 = inlined_call_operand.vmem [shape: f32[8,1], index: 5, kind: output, shape index: {}]  }
   0x1   :  { %12 = vsyncpa [#allocation6], 0  ;;  %s365_s18 = smov [#allocation3]   ;;  %s366_s20 = smov [#allocation5]  }
   0x2   :  { %s19_s19 = sshll.u32 %s365_s18, 4  ;;  %s28_s21 = sshll.u32 %s366_s20, 4  ;;  %s20_s19 = int_to_ptr.vmem [resolvable:$true] %s19_s19  ;;  %s399_s21 = int_to_ptr.vmem [resolvable:$true] %s28_s21 }
   0x3   :  { %s317_s24 = scalar_lea.hbm %s442_s0, 128 }
   0x4   :  { %p318_p0 = scmp.ne.s32.totalorder %s442_s0, %s317_s24  ;;  %p321_p1 = scmp.lt.u32.totalorder %s317_s24, %s442_s0 }
   0x6   :  { %p323_p2 = pnand %p321_p1, %p318_p0 }
   0x8   :  { %326 = shalt.err (!%p323_p2)
}
   0x9   :  { %s327_s29 = scalar_lea.vmem %s20_s19, 128  ;;  %p332_p4 = scmp.lt.s32.totalorder %s20_s19, %s20_s19 }
   0xa   :  { %p328_p3 = scmp.ne.s32.totalorder %s20_s19, %s327_s29  ;;  %p333_p5 = scmp.lt.s32.totalorder %s327_s29, %s327_s29 }
   0xc   :  { %p334_p6 = por %p333_p5, %p332_p4 }
   0xe   :  { %p335_p7 = pnand %p334_p6, %p328_p3 }
  0x10   :  { %338 = shalt.err (!%p335_p7)
}
  0x11   :  { %22 = dma.hbm_to_vmem [thread:$0]  %s442_s0, 128, %s20_s19, [#allocation4]  }
  0x12   :  { %s339_s9 = scalar_lea.hbm %s443_s1, 2048 }
  0x13   :  { %p340_p8 = scmp.ne.s32.totalorder %s443_s1, %s339_s9  ;;  %p343_p9 = scmp.lt.u32.totalorder %s339_s9, %s443_s1 }
  0x15   :  { %p345_p10 = pnand %p343_p9, %p340_p8 }
  0x17   :  { %348 = shalt.err (!%p345_p10)
}
  0x18   :  { %s349_s14 = scalar_lea.vmem %s399_s21, 2048  ;;  %p354_p12 = scmp.lt.s32.totalorder %s399_s21, %s399_s21 }
  0x19   :  { %p350_p11 = scmp.ne.s32.totalorder %s399_s21, %s349_s14  ;;  %p355_p13 = scmp.lt.s32.totalorder %s349_s14, %s349_s14 }
  0x1b   :  { %p356_p0 = por %p355_p13, %p354_p12 }
  0x1d   :  { %p357_p1 = pnand %p356_p0, %p350_p11 }
  0x1f   :  { %360 = shalt.err (!%p357_p1)
}
  0x20   :  { %s367_s0 = smov 64   ;;  %s368_s15 = smov 4  }
  0x21   :  { %34 = dma.hbm_to_vmem [thread:$0]  %s443_s1, 2048, %s399_s21, [#allocation6], %s367_s0, %s367_s0, %s368_s15  }
  0x22   :  { %361 = dma.done.wait [#allocation4], 128  }
  0x23   :  { %362 = vsyncadd [#allocation4], 4294967168 }
  0x24   :  { %363 = dma.done.wait [#allocation6], 2048  }
  0x25   :  { %364 = vsyncadd [#allocation6], 4294965248  ;;  %v299_v0 = vld [vmem:[#allocation5 + $0x40] sm:$0xff]   ;;  %v301_v2 = vld [vmem:[#allocation5 + $0x48] sm:$0xff]   ;;  %v243_v29 = vstv %s446_s4  ;;  %vm245_vm0 = vcmask 7168  }
  0x26   :  { %v300_v1 = vld [vmem:[#allocation5] sm:$0xff]   ;;  %273 = vmatprep.subr.bf16.mxu0 %v299_v0  ;;  %v302_v3 = vld [vmem:[#allocation5 + $0x8] sm:$0xff]   ;;  %v303_v4 = vld [vmem:[#allocation5 + $0x50] sm:$0xff]  }
  0x27   :  { %274 = vmatpush3.bf16.msra.mxu0 %v300_v1  ;;  %v304_v5 = vld [vmem:[#allocation5 + $0x10] sm:$0xff]   ;;  %v305_v6 = vld [vmem:[#allocation5 + $0x58] sm:$0xff]   ;;  %v307_v8 = vld [vmem:[#allocation5 + $0x60] sm:$0xff]  }
  0x28   :  { %275 = vmatprep.subr.bf16.mxu0 %v301_v2  ;;  %v306_v7 = vld [vmem:[#allocation5 + $0x18] sm:$0xff]   ;;  %v308_v9 = vld [vmem:[#allocation5 + $0x20] sm:$0xff]   ;;  %v309_v10 = vld [vmem:[#allocation5 + $0x68] sm:$0xff]  }
  0x29   :  { %v48_v11 = vld [vmem:[#allocation3] sm:$0xff]  ;;  %v310_v13 = vld [vmem:[#allocation5 + $0x28] sm:$0xff]   ;;  %v311_v14 = vld [vmem:[#allocation5 + $0x70] sm:$0xff]  }
  0x2a   :  { %v255_v12 = vcombine.high %v48_v11, %v48_v11  ;;  %v312_v15 = vld [vmem:[#allocation5 + $0x30] sm:$0xff]   ;;  %v313_v16 = vld [vmem:[#allocation5 + $0x78] sm:$0xff]   ;;  %v254_v18 = vcombine.low %v48_v11, %v48_v11 }
  0x2b   :  { %276 = vmatpush3.bf16.msra.mxu0 %v302_v3  ;;  %v314_v17 = vld [vmem:[#allocation5 + $0x38] sm:$0xff]  }
  0x2c   :  { %277 = vmatprep.subr.bf16.mxu0 %v303_v4  ;;  %223 = vmatprep.mubr.bf16.mxu0 %v255_v12  ;;  %v253_v21 = vld [vmem:[%s444_s2] ss:$0 sm:$0xff] }
  0x2d   :  { %v272_v26 = vld [vmem:[%s445_s3] ss:$0 sm:$0xff] }
  0x2f   :  { %278 = vmatpush3.bf16.msra.mxu0 %v304_v5 }
  0x30   :  { %279 = vmatprep.subr.bf16.mxu0 %v305_v6 }
  0x33   :  { %280 = vmatpush3.bf16.msra.mxu0 %v306_v7 }
  0x34   :  { %281 = vmatprep.subr.bf16.mxu0 %v307_v8 }
  0x37   :  { %282 = vmatpush3.bf16.msra.mxu0 %v308_v9 }
  0x38   :  { %283 = vmatprep.subr.bf16.mxu0 %v309_v10 }
  0x3b   :  { %284 = vmatpush3.bf16.msra.mxu0 %v310_v13 }
  0x3c   :  { %285 = vmatprep.subr.bf16.mxu0 %v311_v14 }
  0x3f   :  { %286 = vmatpush3.bf16.msra.mxu0 %v312_v15 }
  0x40   :  { %287 = vmatprep.subr.bf16.mxu0 %v313_v16 }
  0x43   :  { %288 = vmatpush3.bf16.msra.mxu0 %v314_v17 }
  0x46   :  { %224 = vmatmul.mubr.bf16.vlgmr.msra.gmra.mrb[0].mxu0 %v254_v18 }
 0x119   :  { %v289_v19 = vpop.f32.mrb[0].mxu0 }
 0x11a   :  { %v290_v20 = vpop.f32.mrb[1].mxu0 }
 0x11b   :  { %v291_v22 = vadd.f32 %v290_v20, %v289_v19  ;;  %v292_v23 = vpop.f32.mrb[2].mxu0 }
 0x11c   :  { %v293_v24 = vpop.f32.mrb[3].mxu0 }
 0x11d   :  { %v226_v25 = vadd.f32 %v291_v22, %v253_v21 }
 0x11f   :  { %v231_v27 = vmax.f32 %v226_v25, 0.0 }
 0x121   :  { %v239_v28 = vmul.f32 %v272_v26, %v231_v27 }
 0x123   :  { %240 = vadd.xlane.f32.xlu0 %v239_v28 }
 0x1b0   :  { %v241_v30 = vpop.xlane.xlu0 %240 }
 0x1b1   :  { %v244_v31 = vadd.f32 %v243_v29, %v241_v30 }
 0x1b3   :  { %246 = vst.msk [vmem:[%s447_s5] sm:$0xff] %vm245_vm0, %v244_v31 }
 0x1b4   :  { %251 = vsyncpa [#allocation4], 1 }
 0x1b5   :  { %252 = vsyncpa [#allocation6], 1 }

</bundles_post_ra>
